<compile_context>
chip_gen: v7x
topology: tpu7x:2x2x1
jax: 0.10.0
libtpu: 0.0.40
codegen_flags: <defaults>
</compile_context>

<pallas_src>
import jax
import jax.numpy as jnp
from jax.experimental import pallas as pl
from jax.experimental.pallas import tpu as pltpu


def mlp_kernel(x_ref, w1_ref, b1_ref, w2_ref, b2_ref, w3_ref, b3_ref, o_ref):
    # fc1 (bf16 MXU, f32 accum) + bias + ReLU in f32
    h = jnp.dot(x_ref[...], w1_ref[...], preferred_element_type=jnp.float32)
    h = jnp.maximum(h + b1_ref[...], 0.0)
    # fc2
    h = jnp.dot(h.astype(w2_ref.dtype), w2_ref[...],
                preferred_element_type=jnp.float32)
    h = jnp.maximum(h + b2_ref[...], 0.0)
    # fc3 + sigmoid (f32 on the EUP)
    y = jnp.dot(h.astype(w3_ref.dtype), w3_ref[...],
                preferred_element_type=jnp.float32)
    y = jax.nn.sigmoid(y + b3_ref[...])
    o_ref[...] = y.astype(o_ref.dtype)


def _round_up(x, m):
    return ((x + m - 1) // m) * m


def mlp_forward(x, params, *, max_batch_tile=512):
    """Run the fused MLP Pallas kernel.

    x: [B, input_dim] float32
    params: dict with w1 [in,H], b1 [1,H], w2 [H,H], b2 [1,H],
            w3 [H,out], b3 [1,out]   (weights stored as [in, out])
    returns: [B, output_dim] float32
    """
    B, input_dim = x.shape
    hidden_dim = params["w1"].shape[1]
    output_dim = params["w3"].shape[1]

    f32, bf16 = jnp.float32, jnp.bfloat16

    # Pad feature dims to the 128-lane width (dense MXU passes, lane-dense stores).
    in_p = _round_up(input_dim, 128)
    hid_p = _round_up(hidden_dim, 128)
    out_p = _round_up(output_dim, 128)

    # Batch tile: as large as max_batch_tile, multiple of 8 sublanes; pad B to it.
    tb = min(max_batch_tile, _round_up(B, 8))
    b_p = _round_up(B, tb)

    # Zero-pad + cast. Weights/x -> bf16 (MXU fast path, half the HBM/VMEM
    # bytes); biases stay f32 and are added to the f32 accumulator.
    xp = jnp.zeros((b_p, in_p), bf16).at[:B, :input_dim].set(x.astype(bf16))
    w1 = jnp.zeros((in_p, hid_p), bf16).at[:input_dim, :hidden_dim].set(
        params["w1"].astype(bf16))
    w2 = jnp.zeros((hid_p, hid_p), bf16).at[:hidden_dim, :hidden_dim].set(
        params["w2"].astype(bf16))
    w3 = jnp.zeros((hid_p, out_p), bf16).at[:hidden_dim, :output_dim].set(
        params["w3"].astype(bf16))
    b1 = jnp.zeros((1, hid_p), f32).at[:, :hidden_dim].set(params["b1"].astype(f32))
    b2 = jnp.zeros((1, hid_p), f32).at[:, :hidden_dim].set(params["b2"].astype(f32))
    b3 = jnp.zeros((1, out_p), f32).at[:, :output_dim].set(params["b3"].astype(f32))

    grid = (b_p // tb,)

    # Constant block index -> Pallas keeps these resident in VMEM (no re-DMA).
    const = lambda shape: pl.BlockSpec(shape, lambda i: (0, 0))

    flops = 2 * b_p * (in_p * hid_p + hid_p * hid_p + hid_p * out_p)
    bytes_accessed = (
        xp.size * 2 + w1.size * 2 + w2.size * 2 + w3.size * 2
        + (b1.size + b2.size + b3.size) * 4 + b_p * out_p * 4
    )

    y_pad = pl.pallas_call(
        mlp_kernel,
        out_shape=jax.ShapeDtypeStruct((b_p, out_p), f32),
        grid=grid,
        in_specs=[
            pl.BlockSpec((tb, in_p), lambda i: (i, 0)),   # x: streamed per tile
            const((in_p, hid_p)),                         # w1 (resident)
            const((1, hid_p)),                            # b1
            const((hid_p, hid_p)),                        # w2
            const((1, hid_p)),                            # b2
            const((hid_p, out_p)),                        # w3
            const((1, out_p)),                            # b3
        ],
        out_specs=pl.BlockSpec((tb, out_p), lambda i: (i, 0)),
        compiler_params=pltpu.CompilerParams(
            dimension_semantics=("parallel",),            # shard batch over TCs (v7x)
            vmem_limit_bytes=64 * 1024 * 1024,            # budgeted for v7x's 64 MiB
        ),
        cost_estimate=pl.CostEstimate(
            flops=flops,
            transcendentals=b_p * out_p,                  # sigmoid
            bytes_accessed=bytes_accessed,
        ),
    )(xp, w1, b1, w2, b2, w3, b3)

    # Slice off batch / output-feature padding.
    return y_pad[:B, :output_dim]


def init_params(key, input_dim, output_dim, hidden_dim=128):
    """Deterministic init mimicking nn.Linear's uniform(-1/sqrt(in), 1/sqrt(in))."""
    ks = jax.random.split(key, 6)

    def linear_init(kw, kb, fan_in, fan_out):
        bound = 1.0 / jnp.sqrt(fan_in)
        w = jax.random.uniform(kw, (fan_in, fan_out), jnp.float32, -bound, bound)
        b = jax.random.uniform(kb, (1, fan_out), jnp.float32, -bound, bound)
        return w, b

    w1, b1 = linear_init(ks[0], ks[1], input_dim, hidden_dim)
    w2, b2 = linear_init(ks[2], ks[3], hidden_dim, hidden_dim)
    w3, b3 = linear_init(ks[4], ks[5], hidden_dim, output_dim)
    return {"w1": w1, "b1": b1, "w2": w2, "b2": b2, "w3": w3, "b3": b3}


def mlp_reference(x, p):
    h = jnp.maximum(x @ p["w1"] + p["b1"], 0.0)
    h = jnp.maximum(h @ p["w2"] + p["b2"], 0.0)
    return jax.nn.sigmoid(h @ p["w3"] + p["b3"])


if __name__ == "__main__":
    key = jax.random.PRNGKey(0)
    k_params, k_x = jax.random.split(key)

    batch = 8
    input_dim = 32
    output_dim = 16
    hidden_dim = 128

    params = init_params(k_params, input_dim, output_dim, hidden_dim)
    x = jax.random.normal(k_x, (batch, input_dim), jnp.float32)

    y = mlp_forward(x, params)
    y = jax.block_until_ready(y)

    y_ref = mlp_reference(x, params)
    assert y.shape == (batch, output_dim)
    # bf16 matmuls vs f32 reference -> loosened tolerance (sigmoid output in [0,1]).
    assert jnp.allclose(y, y_ref, atol=2e-2, rtol=2e-2), "mismatch vs reference"

    print("KERNEL_OK")
</pallas_src>

<mosaic_0001>
module attributes {stable_mosaic.version = 11 : i64} {
  func.func @mlp_kernel(%arg0: i32, %arg1: memref<8x128xbf16, #tpu.memory_space<vmem>>, %arg2: memref<128x128xbf16, #tpu.memory_space<vmem>>, %arg3: memref<1x128xf32, #tpu.memory_space<vmem>>, %arg4: memref<128x128xbf16, #tpu.memory_space<vmem>>, %arg5: memref<1x128xf32, #tpu.memory_space<vmem>>, %arg6: memref<128x128xbf16, #tpu.memory_space<vmem>>, %arg7: memref<1x128xf32, #tpu.memory_space<vmem>>, %arg8: memref<8x128xf32, #tpu.memory_space<vmem>>) attributes {dimension_semantics = [#tpu.dimension_semantics<parallel>], iteration_bounds = array<i64: 1>, scalar_prefetch = 0 : i64, scratch_operands = 0 : i64, tpu.core_type = #tpu.core_type<tc>, window_params = [{transform_indices = @transform_0, window_bounds = array<i64: 8, 128>}, {pipeline_mode = #tpu.pipeline_mode<synchronous>, transform_indices = @transform_1, window_bounds = array<i64: 128, 128>}, {pipeline_mode = #tpu.pipeline_mode<synchronous>, transform_indices = @transform_2, window_bounds = array<i64: 1, 128>}, {pipeline_mode = #tpu.pipeline_mode<synchronous>, transform_indices = @transform_3, window_bounds = array<i64: 128, 128>}, {pipeline_mode = #tpu.pipeline_mode<synchronous>, transform_indices = @transform_4, window_bounds = array<i64: 1, 128>}, {pipeline_mode = #tpu.pipeline_mode<synchronous>, transform_indices = @transform_5, window_bounds = array<i64: 128, 128>}, {pipeline_mode = #tpu.pipeline_mode<synchronous>, transform_indices = @transform_6, window_bounds = array<i64: 1, 128>}, {transform_indices = @transform_7, window_bounds = array<i64: 8, 128>}]} {
    %c0 = arith.constant 0 : index
    %c0_0 = arith.constant 0 : index
    %0 = vector.load %arg1[%c0, %c0_0] : memref<8x128xbf16, #tpu.memory_space<vmem>>, vector<8x128xbf16>
    %c0_1 = arith.constant 0 : index
    %c0_2 = arith.constant 0 : index
    %1 = vector.load %arg2[%c0_1, %c0_2] : memref<128x128xbf16, #tpu.memory_space<vmem>>, vector<128x128xbf16>
    %cst = arith.constant dense<0.000000e+00> : vector<8x128xf32>
    %2 = tpu.matmul %0, %1, %cst {dimension_numbers = #tpu.dot_dimension_numbers<[1], [0], [0], [1], [0, 0, 1, 1], [], []>} : vector<8x128xbf16>, vector<128x128xbf16>, vector<8x128xf32> -> vector<8x128xf32>
    %c0_3 = arith.constant 0 : index
    %c0_4 = arith.constant 0 : index
    %3 = vector.load %arg3[%c0_3, %c0_4] : memref<1x128xf32, #tpu.memory_space<vmem>>, vector<1x128xf32>
    %4 = vector.broadcast %3 : vector<1x128xf32> to vector<8x128xf32>
    %5 = arith.addf %2, %4 : vector<8x128xf32>
    %cst_5 = arith.constant 0.000000e+00 : f32
    %6 = vector.broadcast %cst_5 : f32 to vector<8x128xf32>
    %7 = arith.maximumf %5, %6 : vector<8x128xf32>
    %8 = arith.truncf %7 : vector<8x128xf32> to vector<8x128xbf16>
    %c0_6 = arith.constant 0 : index
    %c0_7 = arith.constant 0 : index
    %9 = vector.load %arg4[%c0_6, %c0_7] : memref<128x128xbf16, #tpu.memory_space<vmem>>, vector<128x128xbf16>
    %cst_8 = arith.constant dense<0.000000e+00> : vector<8x128xf32>
    %10 = tpu.matmul %8, %9, %cst_8 {dimension_numbers = #tpu.dot_dimension_numbers<[1], [0], [0], [1], [0, 0, 1, 1], [], []>} : vector<8x128xbf16>, vector<128x128xbf16>, vector<8x128xf32> -> vector<8x128xf32>
    %c0_9 = arith.constant 0 : index
    %c0_10 = arith.constant 0 : index
    %11 = vector.load %arg5[%c0_9, %c0_10] : memref<1x128xf32, #tpu.memory_space<vmem>>, vector<1x128xf32>
    %12 = vector.broadcast %11 : vector<1x128xf32> to vector<8x128xf32>
    %13 = arith.addf %10, %12 : vector<8x128xf32>
    %cst_11 = arith.constant 0.000000e+00 : f32
    %14 = vector.broadcast %cst_11 : f32 to vector<8x128xf32>
    %15 = arith.maximumf %13, %14 : vector<8x128xf32>
    %16 = arith.truncf %15 : vector<8x128xf32> to vector<8x128xbf16>
    %c0_12 = arith.constant 0 : index
    %c0_13 = arith.constant 0 : index
    %17 = vector.load %arg6[%c0_12, %c0_13] : memref<128x128xbf16, #tpu.memory_space<vmem>>, vector<128x128xbf16>
    %cst_14 = arith.constant dense<0.000000e+00> : vector<8x128xf32>
    %18 = tpu.matmul %16, %17, %cst_14 {dimension_numbers = #tpu.dot_dimension_numbers<[1], [0], [0], [1], [0, 0, 1, 1], [], []>} : vector<8x128xbf16>, vector<128x128xbf16>, vector<8x128xf32> -> vector<8x128xf32>
    %c0_15 = arith.constant 0 : index
    %c0_16 = arith.constant 0 : index
    %19 = vector.load %arg7[%c0_15, %c0_16] : memref<1x128xf32, #tpu.memory_space<vmem>>, vector<1x128xf32>
    %20 = vector.broadcast %19 : vector<1x128xf32> to vector<8x128xf32>
    %21 = arith.addf %18, %20 : vector<8x128xf32>
    %22 = arith.negf %21 : vector<8x128xf32>
    %23 = math.exp %22 : vector<8x128xf32>
    %cst_17 = arith.constant 1.000000e+00 : f32
    %24 = vector.broadcast %cst_17 : f32 to vector<8x128xf32>
    %25 = arith.addf %24, %23 : vector<8x128xf32>
    %26 = arith.divf %24, %25 : vector<8x128xf32>
    %c0_18 = arith.constant 0 : index
    %c0_19 = arith.constant 0 : index
    %27 = vector.load %arg8[%c0_18, %c0_19] : memref<8x128xf32, #tpu.memory_space<vmem>>, vector<8x128xf32>
    tpu.vector_store %arg8[%c0_18, %c0_19], %26 {strides = array<i32>} : memref<8x128xf32, #tpu.memory_space<vmem>>, vector<8x128xf32>,
    return
  }
  func.func @transform_0(%arg0: i32) -> (i32, i32) {
    %c0_i32 = arith.constant 0 : i32
    %c0_i32_0 = arith.constant 0 : i32
    return %arg0, %c0_i32 : i32, i32
  }
  func.func @transform_1(%arg0: i32) -> (i32, i32) {
    %c0_i32 = arith.constant 0 : i32
    %c0_i32_0 = arith.constant 0 : i32
    %c0_i32_1 = arith.constant 0 : i32
    return %c0_i32, %c0_i32_0 : i32, i32
  }
  func.func @transform_2(%arg0: i32) -> (i32, i32) {
    %c0_i32 = arith.constant 0 : i32
    %c0_i32_0 = arith.constant 0 : i32
    %c0_i32_1 = arith.constant 0 : i32
    return %c0_i32, %c0_i32_0 : i32, i32
  }
  func.func @transform_3(%arg0: i32) -> (i32, i32) {
    %c0_i32 = arith.constant 0 : i32
    %c0_i32_0 = arith.constant 0 : i32
    %c0_i32_1 = arith.constant 0 : i32
    return %c0_i32, %c0_i32_0 : i32, i32
  }
  func.func @transform_4(%arg0: i32) -> (i32, i32) {
    %c0_i32 = arith.constant 0 : i32
    %c0_i32_0 = arith.constant 0 : i32
    %c0_i32_1 = arith.constant 0 : i32
    return %c0_i32, %c0_i32_0 : i32, i32
  }
  func.func @transform_5(%arg0: i32) -> (i32, i32) {
    %c0_i32 = arith.constant 0 : i32
    %c0_i32_0 = arith.constant 0 : i32
    %c0_i32_1 = arith.constant 0 : i32
    return %c0_i32, %c0_i32_0 : i32, i32
  }
  func.func @transform_6(%arg0: i32) -> (i32, i32) {
    %c0_i32 = arith.constant 0 : i32
    %c0_i32_0 = arith.constant 0 : i32
    %c0_i32_1 = arith.constant 0 : i32
    return %c0_i32, %c0_i32_0 : i32, i32
  }
  func.func @transform_7(%arg0: i32) -> (i32, i32) {
    %c0_i32 = arith.constant 0 : i32
    %c0_i32_0 = arith.constant 0 : i32
    return %arg0, %c0_i32 : i32, i32
  }
}

</mosaic_0001>

<bundles_post_ra>
// kernel: tpu_custom_call.1
= control target key start
LH: loop header
LB: loop body
LE: loop exit
PB: predicated region body
PF: predicated region fallthrough
CT: control target
= control target key end

     0   :  { %12 = vsyncpa [#allocation3], 0  ;;  %s1006_s0 = inlined_call_operand.hbm [shape: bf16[8,128], index: 0, kind: input, shape index: {}]   ;;  %s1007_s1 = inlined_call_operand.hbm [shape: bf16[128,128], index: 1, kind: input, shape index: {}]   ;;  %s1008_s2 = inlined_call_operand.hbm [shape: f32[1,128], index: 2, kind: input, shape index: {}]   ;;  %s1009_s3 = inlined_call_operand.hbm [shape: bf16[128,128], index: 3, kind: input, shape index: {}]   ;;  %s1010_s4 = inlined_call_operand.hbm [shape: f32[1,128], index: 4, kind: input, shape index: {}]   ;;  %s1011_s5 = inlined_call_operand.hbm [shape: bf16[128,128], index: 5, kind: input, shape index: {}]   ;;  %s1012_s6 = inlined_call_operand.hbm [shape: f32[1,128], index: 6, kind: input, shape index: {}]   ;;  %s1013_s7 = inlined_call_operand.hbm [shape: f32[8,128], index: 7, kind: output, shape index: {}]  }
   0x1   :  { %13 = vsyncpa [#allocation6], 0 }
   0x2   :  { %14 = vsyncpa [#allocation9], 0 }
   0x3   :  { %15 = vsyncpa [#allocation12], 0 }
   0x4   :  { %16 = vsyncpa [#allocation4], 0  ;;  %s819_s24 = smov [#allocation5]   ;;  %s633_s28 = scalar_lea.hbm %s1007_s1, 1024 }
   0x5   :  { %s32_s25 = sshll.u32 %s819_s24, 4  ;;  %p634_p0 = scmp.ne.s32.totalorder %s1007_s1, %s633_s28  ;;  %s33_s25 = int_to_ptr.vmem [resolvable:$true] %s32_s25 }
   0x6   :  { %p637_p1 = scmp.lt.u32.totalorder %s633_s28, %s1007_s1 }
   0x8   :  { %p639_p2 = pnand %p637_p1, %p634_p0 }
   0xa   :  { %642 = shalt.err (!%p639_p2)
}
   0xb   :  { %s643_s10 = scalar_lea.vmem %s33_s25, 1024  ;;  %p648_p4 = scmp.lt.s32.totalorder %s33_s25, %s33_s25 }
   0xc   :  { %p644_p3 = scmp.ne.s32.totalorder %s33_s25, %s643_s10  ;;  %p649_p5 = scmp.lt.s32.totalorder %s643_s10, %s643_s10 }
   0xe   :  { %p650_p6 = por %p649_p5, %p648_p4 }
  0x10   :  { %p651_p7 = pnand %p650_p6, %p644_p3 }
  0x12   :  { %654 = shalt.err (!%p651_p7)
}
  0x13   :  { %s820_s11 = smov 64   ;;  %s821_s12 = smov 4  }
  0x14   :  { %38 = dma.hbm_to_vmem [thread:$0]  %s1007_s1, 1024, %s33_s25, [#allocation6], %s820_s11, %s820_s11, %s821_s12  }
  0x15   :  { %s822_s15 = smov [#allocation8]   ;;  %s823_s17 = smov [#allocation11]  }
  0x16   :  { %s54_s16 = sshll.u32 %s822_s15, 4  ;;  %s76_s18 = sshll.u32 %s823_s17, 4  ;;  %s55_s16 = int_to_ptr.vmem [resolvable:$true] %s54_s16  ;;  %s77_s18 = int_to_ptr.vmem [resolvable:$true] %s76_s18 }
  0x17   :  { %s655_s21 = scalar_lea.hbm %s1009_s3, 1024 }
  0x18   :  { %p656_p8 = scmp.ne.s32.totalorder %s1009_s3, %s655_s21  ;;  %p659_p9 = scmp.lt.u32.totalorder %s655_s21, %s1009_s3 }
  0x1a   :  { %p661_p10 = pnand %p659_p9, %p656_p8 }
  0x1c   :  { %664 = shalt.err (!%p661_p10)
}
  0x1d   :  { %s665_s1 = scalar_lea.vmem %s55_s16, 1024  ;;  %p670_p12 = scmp.lt.s32.totalorder %s55_s16, %s55_s16 }
  0x1e   :  { %p666_p11 = scmp.ne.s32.totalorder %s55_s16, %s665_s1  ;;  %p671_p13 = scmp.lt.s32.totalorder %s665_s1, %s665_s1 }
  0x20   :  { %p672_p0 = por %p671_p13, %p670_p12 }
  0x22   :  { %p673_p1 = pnand %p672_p0, %p666_p11 }
  0x24   :  { %676 = shalt.err (!%p673_p1)
}
  0x25   :  { %60 = dma.hbm_to_vmem [thread:$0]  %s1009_s3, 1024, %s55_s16, [#allocation9], %s820_s11, %s820_s11, %s821_s12  }
  0x26   :  { %s677_s30 = scalar_lea.hbm %s1011_s5, 1024 }
  0x27   :  { %p678_p2 = scmp.ne.s32.totalorder %s1011_s5, %s677_s30  ;;  %p681_p3 = scmp.lt.u32.totalorder %s677_s30, %s1011_s5 }
  0x29   :  { %p683_p4 = pnand %p681_p3, %p678_p2 }
  0x2b   :  { %686 = shalt.err (!%p683_p4)
}
  0x2c   :  { %s687_s14 = scalar_lea.vmem %s77_s18, 1024  ;;  %p692_p6 = scmp.lt.s32.totalorder %s77_s18, %s77_s18 }
  0x2d   :  { %p688_p5 = scmp.ne.s32.totalorder %s77_s18, %s687_s14  ;;  %p693_p7 = scmp.lt.s32.totalorder %s687_s14, %s687_s14 }
  0x2f   :  { %p694_p8 = por %p693_p7, %p692_p6 }
  0x31   :  { %p695_p9 = pnand %p694_p8, %p688_p5 }
  0x33   :  { %698 = shalt.err (!%p695_p9)
}
  0x34   :  { %82 = dma.hbm_to_vmem [thread:$0]  %s1011_s5, 1024, %s77_s18, [#allocation12], %s820_s11, %s820_s11, %s821_s12  }
  0x35   :  { %s824_s16 = smov [#allocation2]   ;;  %s825_s19 = smov [#allocation7]  }
  0x36   :  { %s23_s17 = sshll.u32 %s824_s16, 4  ;;  %s45_s20 = sshll.u32 %s825_s19, 4  ;;  %s24_s17 = int_to_ptr.vmem [resolvable:$true] %s23_s17  ;;  %s46_s20 = int_to_ptr.vmem [resolvable:$true] %s45_s20 }
  0x37   :  { %s699_s23 = scalar_lea.hbm %s1006_s0, 64 }
  0x38   :  { %p700_p10 = scmp.ne.s32.totalorder %s1006_s0, %s699_s23  ;;  %p703_p11 = scmp.lt.u32.totalorder %s699_s23, %s1006_s0 }
  0x3a   :  { %p705_p12 = pnand %p703_p11, %p700_p10 }
  0x3c   :  { %708 = shalt.err (!%p705_p12)
}
  0x3d   :  { %s709_s5 = scalar_lea.vmem %s24_s17, 64  ;;  %p714_p0 = scmp.lt.s32.totalorder %s24_s17, %s24_s17 }
  0x3e   :  { %p710_p13 = scmp.ne.s32.totalorder %s24_s17, %s709_s5  ;;  %p715_p1 = scmp.lt.s32.totalorder %s709_s5, %s709_s5 }
  0x40   :  { %p716_p2 = por %p715_p1, %p714_p0 }
  0x42   :  { %p717_p3 = pnand %p716_p2, %p710_p13 }
  0x44   :  { %720 = shalt.err (!%p717_p3)
}
  0x45   :  { %26 = dma.hbm_to_vmem [thread:$0]  %s1006_s0, 64, %s24_s17, [#allocation3]  }
  0x46   :  { %s721_s28 = scalar_lea.hbm %s1008_s2, 16 }
  0x47   :  { %p722_p4 = scmp.ne.s32.totalorder %s1008_s2, %s721_s28  ;;  %p725_p5 = scmp.lt.u32.totalorder %s721_s28, %s1008_s2 }
  0x49   :  { %p727_p6 = pnand %p725_p5, %p722_p4 }
  0x4b   :  { %730 = shalt.err (!%p727_p6)
}
  0x4c   :  { %s731_s10 = scalar_lea.vmem %s46_s20, 16  ;;  %s735_s13 = scalar_lea.vmem %s46_s20, 32 }
  0x4d   :  { %p732_p7 = scmp.ne.s32.totalorder %s46_s20, %s731_s10  ;;  %p736_p8 = scmp.lt.s32.totalorder %s46_s20, %s46_s20 }
  0x4e   :  { %p737_p9 = scmp.lt.s32.totalorder %s735_s13, %s731_s10 }
  0x50   :  { %p738_p10 = por %p737_p9, %p736_p8 }
  0x52   :  { %p739_p11 = pnand %p738_p10, %p732_p7 }
  0x54   :  { %742 = shalt.err (!%p739_p11)
}
  0x55   :  { %48 = dma.hbm_to_vmem [thread:$0]  %s1008_s2, 16, %s46_s20, [#allocation6]  }
  0x56   :  { %s826_s3 = smov [#allocation10]   ;;  %s827_s16 = smov [#allocation13]  }
  0x57   :  { %s67_s15 = sshll.u32 %s826_s3, 4  ;;  %s89_s17 = sshll.u32 %s827_s16, 4  ;;  %s68_s15 = int_to_ptr.vmem [resolvable:$true] %s67_s15  ;;  %s90_s17 = int_to_ptr.vmem [resolvable:$true] %s89_s17 }
  0x58   :  { %s743_s22 = scalar_lea.hbm %s1010_s4, 16 }
  0x59   :  { %p744_p12 = scmp.ne.s32.totalorder %s1010_s4, %s743_s22  ;;  %p747_p13 = scmp.lt.u32.totalorder %s743_s22, %s1010_s4 }
  0x5b   :  { %p749_p0 = pnand %p747_p13, %p744_p12 }
  0x5d   :  { %752 = shalt.err (!%p749_p0)
}
  0x5e   :  { %s753_s2 = scalar_lea.vmem %s68_s15, 16  ;;  %s757_s20 = scalar_lea.vmem %s68_s15, 32 }
  0x5f   :  { %p754_p1 = scmp.ne.s32.totalorder %s68_s15, %s753_s2  ;;  %p758_p2 = scmp.lt.s32.totalorder %s68_s15, %s68_s15 }
  0x60   :  { %p759_p3 = scmp.lt.s32.totalorder %s757_s20, %s753_s2 }
  0x62   :  { %p760_p4 = por %p759_p3, %p758_p2 }
  0x64   :  { %p761_p5 = pnand %p760_p4, %p754_p1 }
  0x66   :  { %764 = shalt.err (!%p761_p5)
}
  0x67   :  { %70 = dma.hbm_to_vmem [thread:$0]  %s1010_s4, 16, %s68_s15, [#allocation9]  }
  0x68   :  { %s765_s18 = scalar_lea.hbm %s1012_s6, 16 }
  0x69   :  { %p766_p6 = scmp.ne.s32.totalorder %s1012_s6, %s765_s18  ;;  %p769_p7 = scmp.lt.u32.totalorder %s765_s18, %s1012_s6 }
  0x6b   :  { %p771_p8 = pnand %p769_p7, %p766_p6 }
  0x6d   :  { %774 = shalt.err (!%p771_p8)
}
  0x6e   :  { %s775_s8 = scalar_lea.vmem %s90_s17, 16  ;;  %s779_s9 = scalar_lea.vmem %s90_s17, 32 }
  0x6f   :  { %p776_p9 = scmp.ne.s32.totalorder %s90_s17, %s775_s8  ;;  %p780_p10 = scmp.lt.s32.totalorder %s90_s17, %s90_s17 }
  0x70   :  { %p781_p11 = scmp.lt.s32.totalorder %s779_s9, %s775_s8 }
  0x72   :  { %p782_p12 = por %p781_p11, %p780_p10 }
  0x74   :  { %p783_p13 = pnand %p782_p12, %p776_p9 }
  0x76   :  { %786 = shalt.err (!%p783_p13)
}
  0x77   :  { %92 = dma.hbm_to_vmem [thread:$0]  %s1012_s6, 16, %s90_s17, [#allocation12]  }
  0x78   :  { %809 = dma.done.wait [#allocation3], 64  }
  0x79   :  { %810 = vsyncadd [#allocation3], 4294967232 }
  0x7a   :  { %811 = dma.done.wait [#allocation6], 1040  }
  0x7b   :  { %812 = vsyncadd [#allocation6], 4294966256 }
  0x7c   :  { %813 = dma.done.wait [#allocation9], 1040  }
  0x7d   :  { %814 = vsyncadd [#allocation9], 4294966256 }
  0x7e   :  { %815 = dma.done.wait [#allocation12], 1040  }
  0x7f   :  { %816 = vsyncadd [#allocation12], 4294966256  ;;  %v828_v0 = vmov 0.0   ;;  %vm829_vm0 = vmmov 0   ;;  %v605_v1 = vld [vmem:[#allocation5] sm:$0xff]   ;;  %v606_v2 = vld [vmem:[#allocation5 + $0x8] sm:$0xff]  }
  0x80   :  { %533 = vmatprep.subr.bf16.mxu0 %v828_v0  ;;  %549 = vmatprep.mubr.msk.bf16.mxu0 %vm829_vm0, %v828_v0  ;;  %v607_v3 = vld [vmem:[#allocation5 + $0x10] sm:$0xff]   ;;  %v613_v4 = vld [vmem:[#allocation8] sm:$0xff]   ;;  %v608_v5 = vld [vmem:[#allocation5 + $0x18] sm:$0xff]   ;;  %s830_s6 = smov [#allocation14]  }
  0x81   :  { %553 = vmatprep.subr.bf16.mxu1 %v828_v0  ;;  %569 = vmatprep.mubr.msk.bf16.mxu1 %vm829_vm0, %v828_v0  ;;  %v614_v6 = vld [vmem:[#allocation8 + $0x8] sm:$0xff]   ;;  %v609_v7 = vld [vmem:[#allocation5 + $0x20] sm:$0xff]   ;;  %v615_v8 = vld [vmem:[#allocation8 + $0x10] sm:$0xff]   ;;  %s466_s13 = sshll.u32 %s830_s6, 4  ;;  %s467_s13 = int_to_ptr.vmem [resolvable:$true] %s466_s13 }
  0x82   :  { %534 = vmatpush3.bf16.msra.mxu0 %v605_v1  ;;  %554 = vmatpush3.bf16.msra.mxu1 %v613_v4  ;;  %v610_v9 = vld [vmem:[#allocation5 + $0x28] sm:$0xff]   ;;  %v616_v10 = vld [vmem:[#allocation8 + $0x18] sm:$0xff]   ;;  %v611_v11 = vld [vmem:[#allocation5 + $0x30] sm:$0xff]   ;;  %s787_s0 = scalar_lea.vmem %s467_s13, 128  ;;  %p792_p1 = scmp.lt.s32.totalorder %s467_s13, %s467_s13 }
  0x83   :  { %535 = vmatprep.subr.bf16.mxu0 %v828_v0  ;;  %555 = vmatprep.subr.bf16.mxu1 %v828_v0  ;;  %v617_v12 = vld [vmem:[#allocation8 + $0x20] sm:$0xff]   ;;  %v612_v13 = vld [vmem:[#allocation5 + $0x38] sm:$0xff]   ;;  %v618_v14 = vld [vmem:[#allocation8 + $0x28] sm:$0xff]   ;;  %p788_p0 = scmp.ne.s32.totalorder %s467_s13, %s787_s0  ;;  %p793_p2 = scmp.lt.s32.totalorder %s787_s0, %s787_s0 }
  0x84   :  { %v115_v15 = vld [vmem:[#allocation2] sm:$0xf]  ;;  %v619_v16 = vld [vmem:[#allocation8 + $0x30] sm:$0xff]   ;;  %v621_v18 = vld [vmem:[#allocation11] sm:$0xff]  }
  0x85   :  { %v620_v17 = vld [vmem:[#allocation8 + $0x38] sm:$0xff]   ;;  %v622_v19 = vld [vmem:[#allocation11 + $0x8] sm:$0xff]   ;;  %v625_v22 = vld [vmem:[#allocation11 + $0x20] sm:$0xff]   ;;  %p794_p3 = por %p793_p2, %p792_p1 }
  0x86   :  { %536 = vmatpush3.bf16.msra.mxu0 %v606_v2  ;;  %556 = vmatpush3.bf16.msra.mxu1 %v614_v6  ;;  %v623_v20 = vld [vmem:[#allocation11 + $0x10] sm:$0xff]   ;;  %v624_v21 = vld [vmem:[#allocation11 + $0x18] sm:$0xff]   ;;  %v626_v23 = vld [vmem:[#allocation11 + $0x28] sm:$0xff]  }
  0x87   :  { %537 = vmatprep.subr.bf16.mxu0 %v828_v0  ;;  %557 = vmatprep.subr.bf16.mxu1 %v828_v0  ;;  %v478_v24 = vld [vmem:[#allocation7] ss:$0 sm:$0xff]  ;;  %v627_v32 = vld [vmem:[#allocation11 + $0x30] sm:$0xff]   ;;  %v487_v34 = vld [vmem:[#allocation10] ss:$0 sm:$0xff]  ;;  %p795_p4 = pnand %p794_p3, %p788_p0 }
  0x88   :  { %v628_v33 = vld [vmem:[#allocation11 + $0x38] sm:$0xff]   ;;  %v496_v42 = vld [vmem:[#allocation13] ss:$0 sm:$0xff] }
  0x8a   :  { %538 = vmatpush3.bf16.msra.mxu0 %v607_v3  ;;  %558 = vmatpush3.bf16.msra.mxu1 %v615_v8 }
  0x8b   :  { %539 = vmatprep.subr.bf16.mxu0 %v828_v0  ;;  %559 = vmatprep.subr.bf16.mxu1 %v828_v0 }
  0x8e   :  { %540 = vmatpush3.bf16.msra.mxu0 %v608_v5  ;;  %560 = vmatpush3.bf16.msra.mxu1 %v616_v10 }
  0x8f   :  { %541 = vmatprep.subr.bf16.mxu0 %v828_v0  ;;  %561 = vmatprep.subr.bf16.mxu1 %v828_v0 }
  0x92   :  { %542 = vmatpush3.bf16.msra.mxu0 %v609_v7  ;;  %562 = vmatpush3.bf16.msra.mxu1 %v617_v12 }
  0x93   :  { %543 = vmatprep.subr.bf16.mxu0 %v828_v0  ;;  %563 = vmatprep.subr.bf16.mxu1 %v828_v0 }
  0x96   :  { %544 = vmatpush3.bf16.msra.mxu0 %v610_v9  ;;  %564 = vmatpush3.bf16.msra.mxu1 %v618_v14 }
  0x97   :  { %545 = vmatprep.subr.bf16.mxu0 %v828_v0  ;;  %565 = vmatprep.subr.bf16.mxu1 %v828_v0 }
  0x9a   :  { %546 = vmatpush3.bf16.msra.mxu0 %v611_v11  ;;  %566 = vmatpush3.bf16.msra.mxu1 %v619_v16 }
  0x9b   :  { %547 = vmatprep.subr.bf16.mxu0 %v828_v0  ;;  %567 = vmatprep.subr.bf16.mxu1 %v828_v0 }
  0x9e   :  { %548 = vmatpush3.bf16.msra.mxu0 %v612_v13  ;;  %568 = vmatpush3.bf16.msra.mxu1 %v620_v17 }
  0x9f   :  { %573 = vmatprep.subr.bf16.mxu0 %v828_v0 }
  0xa1   :  { %550 = vmatmul.mubr.bf16.vlgmr.msra.gmra.mrb[0].mxu0 %v115_v15 }
  0xa2   :  { %589 = vmatprep.mubr.msk.bf16.mxu0 %vm829_vm0, %v828_v0  ;;  %574 = vmatpush3.bf16.msra.mxu0 %v621_v18 }
  0xa3   :  { %575 = vmatprep.subr.bf16.mxu0 %v828_v0 }
  0xa6   :  { %576 = vmatpush3.bf16.msra.mxu0 %v622_v19 }
  0xa7   :  { %577 = vmatprep.subr.bf16.mxu0 %v828_v0 }
  0xaa   :  { %578 = vmatpush3.bf16.msra.mxu0 %v623_v20 }
  0xab   :  { %579 = vmatprep.subr.bf16.mxu0 %v828_v0 }
  0xae   :  { %580 = vmatpush3.bf16.msra.mxu0 %v624_v21 }
  0xaf   :  { %581 = vmatprep.subr.bf16.mxu0 %v828_v0 }
  0xb2   :  { %582 = vmatpush3.bf16.msra.mxu0 %v625_v22 }
  0xb3   :  { %583 = vmatprep.subr.bf16.mxu0 %v828_v0 }
  0xb6   :  { %584 = vmatpush3.bf16.msra.mxu0 %v626_v23 }
  0xb7   :  { %585 = vmatprep.subr.bf16.mxu0 %v828_v0 }
  0xba   :  { %586 = vmatpush3.bf16.msra.mxu0 %v627_v32 }
  0xbb   :  { %587 = vmatprep.subr.bf16.mxu0 %v828_v0 }
  0xbe   :  { %588 = vmatpush3.bf16.msra.mxu0 %v628_v33 }
 0x174   :  { %v221_v25 = vpop.f32.mrb[0].mxu0 }
 0x175   :  { %v222_v26 = vadd.f32 %v478_v24, %v221_v25  ;;  %v551_v27 = vpop.f32.mrb[1].mxu0 }
 0x176   :  { %v224_v28 = vpop.f32.mrb[2].mxu0 }
 0x177   :  { %v227_v29 = vmax.f32 %v222_v26, 0.0  ;;  %v552_v30 = vpop.f32.mrb[3].mxu0 }
 0x179   :  { %v228_v31 = vpack.c.bf16 %v227_v29, %v227_v29 }
 0x17b   :  { %570 = vmatmul.mubr.bf16.vlgmr.msra.gmra.mrb[0].mxu1 %v228_v31 }
 0x24e   :  { %v334_v35 = vpop.f32.mrb[0].mxu1 }
 0x24f   :  { %v335_v36 = vadd.f32 %v487_v34, %v334_v35  ;;  %v571_v37 = vpop.f32.mrb[1].mxu1 }
 0x250   :  { %v337_v38 = vpop.f32.mrb[2].mxu1 }
 0x251   :  { %v340_v39 = vmax.f32 %v335_v36, 0.0  ;;  %v572_v40 = vpop.f32.mrb[3].mxu1 }
 0x253   :  { %v341_v41 = vpack.c.bf16 %v340_v39, %v340_v39 }
 0x255   :  { %590 = vmatmul.mubr.bf16.vlgmr.msra.gmra.mrb[4].mxu0 %v341_v41 }
 0x328   :  { %v447_v43 = vpop.f32.mrb[4].mxu0 }
 0x329   :  { %v448_v44 = vadd.f32 %v496_v42, %v447_v43  ;;  %v591_v45 = vpop.f32.mrb[5].mxu0 }
 0x32a   :  { %v450_v46 = vpop.f32.mrb[6].mxu0 }
 0x32b   :  { %v505_v47 = vmul.f32 -1.442695, %v448_v44  ;;  %v592_v48 = vpop.f32.mrb[7].mxu0 }
 0x32d   :  { %629 = vpow2.f32 %v505_v47 }
 0x337   :  { %v630_v49 = vpop.eup %629 }
 0x338   :  { %v456_v50 = vadd.f32 1.0, %v630_v49 }
 0x33a   :  { %631 = vrcp.f32 %v456_v50 }
 0x344   :  { %v632_v51 = vpop.eup %631 }
 0x345   :  { %459 = vst [vmem:[#allocation14] sm:$0xff] %v632_v51 }
 0x346   :  { %798 = shalt.err (!%p795_p4)
}
 0x347   :  { %s799_s15 = scalar_lea.hbm %s1013_s7, 128 }
 0x348   :  { %p800_p5 = scmp.ne.s32.totalorder %s1013_s7, %s799_s15  ;;  %p803_p6 = scmp.lt.u32.totalorder %s799_s15, %s1013_s7 }
 0x34a   :  { %p805_p7 = pnand %p803_p6, %p800_p5 }
 0x34c   :  { %808 = shalt.err (!%p805_p7)
}
 0x34d   :  { %469 = dma.vmem_to_hbm [thread:$0]  %s467_s13, 128, %s1013_s7, [#allocation4]  }
 0x34e   :  { %817 = dma.done.wait [#allocation4], 128  }
 0x34f   :  { %818 = vsyncadd [#allocation4], 4294967168 }
 0x350   :  { %473 = vsyncpa [#allocation3], 1 }
 0x351   :  { %474 = vsyncpa [#allocation6], 1 }
 0x352   :  { %475 = vsyncpa [#allocation9], 1 }
 0x353   :  { %476 = vsyncpa [#allocation12], 1 }
 0x354   :  { %477 = vsyncpa [#allocation4], 1 }

</bundles_post_ra>
